<compile_context>
chip_gen: v7x
topology: tpu7x:2x2x1
jax: 0.10.0
libtpu: 0.0.40
codegen_flags: <defaults>
</compile_context>

<pallas_src>
import functools

import jax
import jax.numpy as jnp
from jax.experimental import pallas as pl
from jax.experimental.pallas import tpu as pltpu

LANE = 128  # TPU lane width / MXU tile width


def _round_up(n, m):
    return (n + m - 1) // m * m


def _ann_kernel(x_ref, w1_ref, b1_ref, w2_ref, b2_ref, w3_ref, b3_ref, o_ref):
    # x tile arrives as f32 (no wrapper-side cast pass); cast to bf16 on the VPU,
    # accumulate every matmul on the MXU in f32.
    x = x_ref[...].astype(jnp.bfloat16)                                   # (TM, K)

    h1 = jnp.dot(x, w1_ref[...], preferred_element_type=jnp.float32) + b1_ref[...]
    h1 = jax.nn.sigmoid(h1)                                               # EUP exp + recip

    h2 = jnp.dot(h1.astype(jnp.bfloat16), w2_ref[...],
                 preferred_element_type=jnp.float32) + b2_ref[...]
    h2 = jax.nn.sigmoid(h2)

    out = jnp.dot(h2.astype(jnp.bfloat16), w3_ref[...],
                  preferred_element_type=jnp.float32) + b3_ref[...]
    o_ref[...] = out.astype(o_ref.dtype)                                  # (TM, 128) unmasked vst


def pack_params(w1, b1, w2, b2, w3, b3):
    """One-time packing: pad feature dims to 128 lanes, weights -> bf16, biases -> f32.

    Zero rows/cols keep the math exact (padded lanes contribute 0 through zeroed
    weight rows, even though sigmoid(0)=0.5 in the padded hidden lanes).
    """
    num_inputs, num_hidden = w1.shape
    num_outputs = w3.shape[1]
    hp = _round_up(num_hidden, LANE)
    op = _round_up(num_outputs, LANE)

    def pad2(a, rows, cols):
        return jnp.pad(a, ((0, rows - a.shape[0]), (0, cols - a.shape[1])))

    w1p = pad2(w1, num_inputs, hp).astype(jnp.bfloat16)
    w2p = pad2(w2, hp, hp).astype(jnp.bfloat16)
    w3p = pad2(w3, hp, op).astype(jnp.bfloat16)
    b1p = pad2(b1.reshape(1, -1), 1, hp).astype(jnp.float32)
    b2p = pad2(b2.reshape(1, -1), 1, hp).astype(jnp.float32)
    b3p = pad2(b3.reshape(1, -1), 1, op).astype(jnp.float32)
    return (w1p, b1p, w2p, b2p, w3p, b3p), num_outputs


@functools.partial(jax.jit, static_argnames=("num_outputs", "block_b"))
def ann_forward(x, w1p, b1p, w2p, b2p, w3p, b3p, *, num_outputs, block_b=1024):
    """Forward pass equivalent to the PyTorch ANN module (x.view(-1, 28*28) -> 3 linears)."""
    num_inputs = w1p.shape[0]
    op = w3p.shape[1]

    x2d = x.reshape(-1, num_inputs).astype(jnp.float32)   # x.view(-1, 28*28), stays f32 in HBM
    B = x2d.shape[0]

    # Batch tile: multiple of 8 sublanes, <= block_b, and <= ceil(B/2) (rounded up to 8)
    # so large batches always give >=2 grid steps (megacore / v7x two-TC sharding).
    tm = max(8, min(block_b, _round_up(-(-B // 2), 8)))
    grid = pl.cdiv(B, tm)   # ragged last tile: OOB rows are write-masked by Pallas

    resident = lambda a: pl.BlockSpec(a.shape, lambda i: (0, 0))  # weights stay VMEM-resident

    out = pl.pallas_call(
        _ann_kernel,
        out_shape=jax.ShapeDtypeStruct((B, op), jnp.float32),
        grid=(grid,),
        in_specs=[
            pl.BlockSpec((tm, num_inputs), lambda i: (i, 0)),     # x: pipelined over batch
            resident(w1p), resident(b1p),
            resident(w2p), resident(b2p),
            resident(w3p), resident(b3p),
        ],
        out_specs=pl.BlockSpec((tm, op), lambda i: (i, 0)),
        compiler_params=pltpu.CompilerParams(
            dimension_semantics=("parallel",),                    # batch rows independent
        ),
    )(x2d, w1p, b1p, w2p, b2p, w3p, b3p)

    return out[:, :num_outputs]


def init_params(key, num_inputs, num_hidden, num_outputs):
    """Deterministic init mirroring nn.Linear's U(-1/sqrt(fan_in), 1/sqrt(fan_in))."""
    ks = jax.random.split(key, 6)

    def linear(kw, kb, fan_in, fan_out):
        bound = 1.0 / jnp.sqrt(jnp.float32(fan_in))
        w = jax.random.uniform(kw, (fan_in, fan_out), jnp.float32, -bound, bound)
        b = jax.random.uniform(kb, (fan_out,), jnp.float32, -bound, bound)
        return w, b

    w1, b1 = linear(ks[0], ks[1], num_inputs, num_hidden)
    w2, b2 = linear(ks[2], ks[3], num_hidden, num_hidden)
    w3, b3 = linear(ks[4], ks[5], num_hidden, num_outputs)
    return w1, b1, w2, b2, w3, b3


if __name__ == "__main__":
    num_inputs = 28 * 28   # forward() hard-codes x.view(-1, 28*28)
    num_hidden = 32
    num_outputs = 10
    batch = 8

    key = jax.random.PRNGKey(0)
    k_x, k_p = jax.random.split(key)

    # Input shaped like MNIST images (B, 1, 28, 28); flattened inside the wrapper.
    x = jax.random.normal(k_x, (batch, 1, 28, 28), jnp.float32)
    params = init_params(k_p, num_inputs, num_hidden, num_outputs)

    packed, n_out = pack_params(*params)          # one-time weight packing (not per call)
    out = ann_forward(x, *packed, num_outputs=n_out)
    jax.block_until_ready(out)

    # Reference check in plain f32 JAX (kernel uses bf16 matmul inputs -> loose tolerance).
    w1, b1, w2, b2, w3, b3 = params
    x2d = x.reshape(batch, num_inputs)
    h1 = jax.nn.sigmoid(x2d @ w1 + b1)
    h2 = jax.nn.sigmoid(h1 @ w2 + b2)
    ref = h2 @ w3 + b3

    assert out.shape == (batch, num_outputs)
    assert jnp.allclose(out, ref, atol=2e-2, rtol=2e-2), float(jnp.abs(out - ref).max())

    print("KERNEL_OK")
</pallas_src>

<mosaic_0001>
module attributes {stable_mosaic.version = 11 : i64} {
  func.func @_ann_kernel(%arg0: i32, %arg1: memref<8x784xf32, #tpu.memory_space<vmem>>, %arg2: memref<784x128xbf16, #tpu.memory_space<vmem>>, %arg3: memref<1x128xf32, #tpu.memory_space<vmem>>, %arg4: memref<128x128xbf16, #tpu.memory_space<vmem>>, %arg5: memref<1x128xf32, #tpu.memory_space<vmem>>, %arg6: memref<128x128xbf16, #tpu.memory_space<vmem>>, %arg7: memref<1x128xf32, #tpu.memory_space<vmem>>, %arg8: memref<8x128xf32, #tpu.memory_space<vmem>>) attributes {dimension_semantics = [#tpu.dimension_semantics<parallel>], iteration_bounds = array<i64: 1>, scalar_prefetch = 0 : i64, scratch_operands = 0 : i64, tpu.core_type = #tpu.core_type<tc>, window_params = [{transform_indices = @transform_0, window_bounds = array<i64: 8, 784>}, {pipeline_mode = #tpu.pipeline_mode<synchronous>, transform_indices = @transform_1, window_bounds = array<i64: 784, 128>}, {pipeline_mode = #tpu.pipeline_mode<synchronous>, transform_indices = @transform_2, window_bounds = array<i64: 1, 128>}, {pipeline_mode = #tpu.pipeline_mode<synchronous>, transform_indices = @transform_3, window_bounds = array<i64: 128, 128>}, {pipeline_mode = #tpu.pipeline_mode<synchronous>, transform_indices = @transform_4, window_bounds = array<i64: 1, 128>}, {pipeline_mode = #tpu.pipeline_mode<synchronous>, transform_indices = @transform_5, window_bounds = array<i64: 128, 128>}, {pipeline_mode = #tpu.pipeline_mode<synchronous>, transform_indices = @transform_6, window_bounds = array<i64: 1, 128>}, {transform_indices = @transform_7, window_bounds = array<i64: 8, 128>}]} {
    %c0 = arith.constant 0 : index
    %c0_0 = arith.constant 0 : index
    %0 = vector.load %arg1[%c0, %c0_0] : memref<8x784xf32, #tpu.memory_space<vmem>>, vector<8x784xf32>
    %1 = arith.truncf %0 : vector<8x784xf32> to vector<8x784xbf16>
    %c0_1 = arith.constant 0 : index
    %c0_2 = arith.constant 0 : index
    %2 = vector.load %arg2[%c0_1, %c0_2] : memref<784x128xbf16, #tpu.memory_space<vmem>>, vector<784x128xbf16>
    %cst = arith.constant dense<0.000000e+00> : vector<8x128xf32>
    %3 = tpu.matmul %1, %2, %cst {dimension_numbers = #tpu.dot_dimension_numbers<[1], [0], [0], [1], [0, 0, 1, 1], [], []>} : vector<8x784xbf16>, vector<784x128xbf16>, vector<8x128xf32> -> vector<8x128xf32>
    %c0_3 = arith.constant 0 : index
    %c0_4 = arith.constant 0 : index
    %4 = vector.load %arg3[%c0_3, %c0_4] : memref<1x128xf32, #tpu.memory_space<vmem>>, vector<1x128xf32>
    %5 = vector.broadcast %4 : vector<1x128xf32> to vector<8x128xf32>
    %6 = arith.addf %3, %5 : vector<8x128xf32>
    %7 = arith.negf %6 : vector<8x128xf32>
    %8 = math.exp %7 : vector<8x128xf32>
    %cst_5 = arith.constant 1.000000e+00 : f32
    %9 = vector.broadcast %cst_5 : f32 to vector<8x128xf32>
    %10 = arith.addf %9, %8 : vector<8x128xf32>
    %11 = arith.divf %9, %10 : vector<8x128xf32>
    %12 = arith.truncf %11 : vector<8x128xf32> to vector<8x128xbf16>
    %c0_6 = arith.constant 0 : index
    %c0_7 = arith.constant 0 : index
    %13 = vector.load %arg4[%c0_6, %c0_7] : memref<128x128xbf16, #tpu.memory_space<vmem>>, vector<128x128xbf16>
    %cst_8 = arith.constant dense<0.000000e+00> : vector<8x128xf32>
    %14 = tpu.matmul %12, %13, %cst_8 {dimension_numbers = #tpu.dot_dimension_numbers<[1], [0], [0], [1], [0, 0, 1, 1], [], []>} : vector<8x128xbf16>, vector<128x128xbf16>, vector<8x128xf32> -> vector<8x128xf32>
    %c0_9 = arith.constant 0 : index
    %c0_10 = arith.constant 0 : index
    %15 = vector.load %arg5[%c0_9, %c0_10] : memref<1x128xf32, #tpu.memory_space<vmem>>, vector<1x128xf32>
    %16 = vector.broadcast %15 : vector<1x128xf32> to vector<8x128xf32>
    %17 = arith.addf %14, %16 : vector<8x128xf32>
    %18 = arith.negf %17 : vector<8x128xf32>
    %19 = math.exp %18 : vector<8x128xf32>
    %cst_11 = arith.constant 1.000000e+00 : f32
    %20 = vector.broadcast %cst_11 : f32 to vector<8x128xf32>
    %21 = arith.addf %20, %19 : vector<8x128xf32>
    %22 = arith.divf %20, %21 : vector<8x128xf32>
    %23 = arith.truncf %22 : vector<8x128xf32> to vector<8x128xbf16>
    %c0_12 = arith.constant 0 : index
    %c0_13 = arith.constant 0 : index
    %24 = vector.load %arg6[%c0_12, %c0_13] : memref<128x128xbf16, #tpu.memory_space<vmem>>, vector<128x128xbf16>
    %cst_14 = arith.constant dense<0.000000e+00> : vector<8x128xf32>
    %25 = tpu.matmul %23, %24, %cst_14 {dimension_numbers = #tpu.dot_dimension_numbers<[1], [0], [0], [1], [0, 0, 1, 1], [], []>} : vector<8x128xbf16>, vector<128x128xbf16>, vector<8x128xf32> -> vector<8x128xf32>
    %c0_15 = arith.constant 0 : index
    %c0_16 = arith.constant 0 : index
    %26 = vector.load %arg7[%c0_15, %c0_16] : memref<1x128xf32, #tpu.memory_space<vmem>>, vector<1x128xf32>
    %27 = vector.broadcast %26 : vector<1x128xf32> to vector<8x128xf32>
    %28 = arith.addf %25, %27 : vector<8x128xf32>
    %c0_17 = arith.constant 0 : index
    %c0_18 = arith.constant 0 : index
    %29 = vector.load %arg8[%c0_17, %c0_18] : memref<8x128xf32, #tpu.memory_space<vmem>>, vector<8x128xf32>
    tpu.vector_store %arg8[%c0_17, %c0_18], %28 {strides = array<i32>} : memref<8x128xf32, #tpu.memory_space<vmem>>, vector<8x128xf32>,
    return
  }
  func.func @transform_0(%arg0: i32) -> (i32, i32) {
    %c0_i32 = arith.constant 0 : i32
    %c0_i32_0 = arith.constant 0 : i32
    return %arg0, %c0_i32 : i32, i32
  }
  func.func @transform_1(%arg0: i32) -> (i32, i32) {
    %c0_i32 = arith.constant 0 : i32
    %c0_i32_0 = arith.constant 0 : i32
    %c0_i32_1 = arith.constant 0 : i32
    return %c0_i32, %c0_i32_0 : i32, i32
  }
  func.func @transform_2(%arg0: i32) -> (i32, i32) {
    %c0_i32 = arith.constant 0 : i32
    %c0_i32_0 = arith.constant 0 : i32
    %c0_i32_1 = arith.constant 0 : i32
    return %c0_i32, %c0_i32_0 : i32, i32
  }
  func.func @transform_3(%arg0: i32) -> (i32, i32) {
    %c0_i32 = arith.constant 0 : i32
    %c0_i32_0 = arith.constant 0 : i32
    %c0_i32_1 = arith.constant 0 : i32
    return %c0_i32, %c0_i32_0 : i32, i32
  }
  func.func @transform_4(%arg0: i32) -> (i32, i32) {
    %c0_i32 = arith.constant 0 : i32
    %c0_i32_0 = arith.constant 0 : i32
    %c0_i32_1 = arith.constant 0 : i32
    return %c0_i32, %c0_i32_0 : i32, i32
  }
  func.func @transform_5(%arg0: i32) -> (i32, i32) {
    %c0_i32 = arith.constant 0 : i32
    %c0_i32_0 = arith.constant 0 : i32
    %c0_i32_1 = arith.constant 0 : i32
    return %c0_i32, %c0_i32_0 : i32, i32
  }
  func.func @transform_6(%arg0: i32) -> (i32, i32) {
    %c0_i32 = arith.constant 0 : i32
    %c0_i32_0 = arith.constant 0 : i32
    %c0_i32_1 = arith.constant 0 : i32
    return %c0_i32, %c0_i32_0 : i32, i32
  }
  func.func @transform_7(%arg0: i32) -> (i32, i32) {
    %c0_i32 = arith.constant 0 : i32
    %c0_i32_0 = arith.constant 0 : i32
    return %arg0, %c0_i32 : i32, i32
  }
}

</mosaic_0001>

<bundles_post_ra>
// kernel: ann_forward.1
= control target key start
LH: loop header
LB: loop body
LE: loop exit
PB: predicated region body
PF: predicated region fallthrough
CT: control target
= control target key end

     0   :  { %v1159_v44 = vmov 0.0   ;;  %vm1160_vm0 = vmmov 0   ;;  %vm441_vm1 = vcmask 130048   ;;  %s1462_s0 = inlined_call_operand.vmem [shape: f32[8,784], index: 0, kind: input, shape index: {}]   ;;  %s1463_s1 = inlined_call_operand.vmem [shape: bf16[784,128], index: 1, kind: input, shape index: {}]   ;;  %s1464_s2 = inlined_call_operand.vmem [shape: f32[1,128], index: 2, kind: input, shape index: {}]   ;;  %s1465_s3 = inlined_call_operand.vmem [shape: bf16[128,128], index: 3, kind: input, shape index: {}]   ;;  %s1466_s4 = inlined_call_operand.vmem [shape: f32[1,128], index: 4, kind: input, shape index: {}]   ;;  %s1467_s5 = inlined_call_operand.vmem [shape: bf16[128,128], index: 5, kind: input, shape index: {}]   ;;  %s1468_s6 = inlined_call_operand.vmem [shape: f32[1,128], index: 6, kind: input, shape index: {}]   ;;  %s1469_s7 = inlined_call_operand.hbm [shape: f32[8,128], index: 7, kind: output, shape index: {}]  }
   0x1   :  { %v1062_v0 = vld [vmem:[%s1463_s1 + $0x40] sm:$0xff]   ;;  %v1066_v4 = vld [vmem:[%s1463_s1 + $0x48] sm:$0xff]   ;;  %v1070_v8 = vld [vmem:[%s1463_s1 + $0x50] sm:$0xff]  }
   0x2   :  { %v1063_v1 = vld [vmem:[%s1463_s1] sm:$0xff]   ;;  %927 = vmatprep.subr.bf16.mxu0 %v1062_v0  ;;  %v1067_v5 = vld [vmem:[%s1463_s1 + $0x8] sm:$0xff]   ;;  %v1071_v9 = vld [vmem:[%s1463_s1 + $0x10] sm:$0xff]  }
   0x3   :  { %v1064_v2 = vld [vmem:[%s1463_s1 + $0xc0] sm:$0xff]   ;;  %928 = vmatpush3.bf16.msra.mxu0 %v1063_v1  ;;  %v1068_v6 = vld [vmem:[%s1463_s1 + $0xc8] sm:$0xff]   ;;  %v1072_v10 = vld [vmem:[%s1463_s1 + $0xd0] sm:$0xff]  }
   0x4   :  { %v1065_v3 = vld [vmem:[%s1463_s1 + $0x80] sm:$0xff]   ;;  %949 = vmatprep.subr.bf16.mxu1 %v1064_v2  ;;  %929 = vmatprep.subr.bf16.mxu0 %v1066_v4  ;;  %v1069_v7 = vld [vmem:[%s1463_s1 + $0x88] sm:$0xff]   ;;  %v1073_v11 = vld [vmem:[%s1463_s1 + $0x90] sm:$0xff]  }
   0x5   :  { %950 = vmatpush3.bf16.msra.mxu1 %v1065_v3  ;;  %v1074_v12 = vld [vmem:[%s1463_s1 + $0x58] sm:$0xff]   ;;  %v1078_v16 = vld [vmem:[%s1463_s1 + $0x60] sm:$0xff]   ;;  %v1082_v20 = vld [vmem:[%s1463_s1 + $0x68] sm:$0xff]  }
   0x6   :  { %951 = vmatprep.subr.bf16.mxu1 %v1068_v6  ;;  %v1075_v13 = vld [vmem:[%s1463_s1 + $0x18] sm:$0xff]   ;;  %v1079_v17 = vld [vmem:[%s1463_s1 + $0x20] sm:$0xff]   ;;  %v1083_v21 = vld [vmem:[%s1463_s1 + $0x28] sm:$0xff]  }
   0x7   :  { %930 = vmatpush3.bf16.msra.mxu0 %v1067_v5  ;;  %v1076_v14 = vld [vmem:[%s1463_s1 + $0xd8] sm:$0xff]   ;;  %v1080_v18 = vld [vmem:[%s1463_s1 + $0xe0] sm:$0xff]   ;;  %v1084_v22 = vld [vmem:[%s1463_s1 + $0xe8] sm:$0xff]  }
   0x8   :  { %931 = vmatprep.subr.bf16.mxu0 %v1070_v8  ;;  %v1077_v15 = vld [vmem:[%s1463_s1 + $0x98] sm:$0xff]   ;;  %v1081_v19 = vld [vmem:[%s1463_s1 + $0xa0] sm:$0xff]   ;;  %v1085_v23 = vld [vmem:[%s1463_s1 + $0xa8] sm:$0xff]  }
   0x9   :  { %952 = vmatpush3.bf16.msra.mxu1 %v1069_v7  ;;  %v1086_v24 = vld [vmem:[%s1463_s1 + $0x70] sm:$0xff]   ;;  %v1090_v28 = vld [vmem:[%s1463_s1 + $0x78] sm:$0xff]   ;;  %v29_v31 = vld [vmem:[%s1462_s0 + $0x8] sm:$0xff] }
   0xa   :  { %953 = vmatprep.subr.bf16.mxu1 %v1072_v10  ;;  %v1087_v25 = vld [vmem:[%s1463_s1 + $0x30] sm:$0xff]   ;;  %v1091_v29 = vld [vmem:[%s1463_s1 + $0x38] sm:$0xff]   ;;  %v36_v32 = vpack.c.bf16 %v29_v31, %v29_v31  ;;  %v28_v34 = vld [vmem:[%s1462_s0] sm:$0xff] }
   0xb   :  { %932 = vmatpush3.bf16.msra.mxu0 %v1071_v9  ;;  %v1088_v26 = vld [vmem:[%s1463_s1 + $0xf0] sm:$0xff]   ;;  %v1092_v30 = vld [vmem:[%s1463_s1 + $0xf8] sm:$0xff]   ;;  %v35_v35 = vpack.c.bf16 %v28_v34, %v28_v34  ;;  %v1094_v36 = vld [vmem:[%s1463_s1 + $0x140] sm:$0xff]  }
   0xc   :  { %933 = vmatprep.subr.bf16.mxu0 %v1074_v12  ;;  %v1089_v27 = vld [vmem:[%s1463_s1 + $0xb0] sm:$0xff]   ;;  %v1093_v33 = vld [vmem:[%s1463_s1 + $0xb8] sm:$0xff]   ;;  %477 = vmatprep.mubr.bf16.mxu0 %v36_v32  ;;  %v1095_v39 = vld [vmem:[%s1463_s1 + $0x100] sm:$0xff]  }
   0xd   :  { %954 = vmatpush3.bf16.msra.mxu1 %v1073_v11  ;;  %v31_v37 = vld [vmem:[%s1462_s0 + $0x18] sm:$0xff]  ;;  %v30_v40 = vld [vmem:[%s1462_s0 + $0x10] sm:$0xff]  ;;  %v1096_v42 = vld [vmem:[%s1463_s1 + $0x148] sm:$0xff]  }
   0xe   :  { %955 = vmatprep.subr.bf16.mxu1 %v1076_v14  ;;  %v38_v38 = vpack.c.bf16 %v31_v37, %v31_v37  ;;  %v37_v41 = vpack.c.bf16 %v30_v40, %v30_v40  ;;  %v1097_v43 = vld [vmem:[%s1463_s1 + $0x108] sm:$0xff]   ;;  %v1098_v45 = vld [vmem:[%s1463_s1 + $0x150] sm:$0xff]   ;;  %v1100_v47 = vld [vmem:[%s1463_s1 + $0x158] sm:$0xff]  }
   0xf   :  { %934 = vmatpush3.bf16.msra.mxu0 %v1075_v13  ;;  %v1099_v46 = vld [vmem:[%s1463_s1 + $0x110] sm:$0xff]   ;;  %v1101_v48 = vld [vmem:[%s1463_s1 + $0x118] sm:$0xff]   ;;  %v1102_v49 = vld [vmem:[%s1463_s1 + $0x160] sm:$0xff]  }
  0x10   :  { %935 = vmatprep.subr.bf16.mxu0 %v1078_v16  ;;  %517 = vmatprep.mubr.bf16.mxu1 %v38_v38  ;;  %v1103_v50 = vld [vmem:[%s1463_s1 + $0x120] sm:$0xff]   ;;  %v1104_v51 = vld [vmem:[%s1463_s1 + $0x168] sm:$0xff]   ;;  %v1106_v55 = vld [vmem:[%s1463_s1 + $0x170] sm:$0xff]  }
  0x11   :  { %956 = vmatpush3.bf16.msra.mxu1 %v1077_v15  ;;  %v1105_v52 = vld [vmem:[%s1463_s1 + $0x128] sm:$0xff]   ;;  %v1110_v53 = vld [vmem:[%s1463_s1 + $0x180] sm:$0xff]   ;;  %v34_v57 = vld [vmem:[%s1462_s0 + $0x30] sm:$0xff] }
  0x12   :  { %957 = vmatprep.subr.bf16.mxu1 %v1080_v18  ;;  %v33_v54 = vld [vmem:[%s1462_s0 + $0x28] sm:$0xff]  ;;  %v41_v58 = vpack.c.bf16 %v34_v57, %v34_v57  ;;  %v1107_v59 = vld [vmem:[%s1463_s1 + $0x130] sm:$0xff]   ;;  %v1108_v60 = vld [vmem:[%s1463_s1 + $0x178] sm:$0xff]  }
  0x13   :  { %936 = vmatpush3.bf16.msra.mxu0 %v1079_v17  ;;  %v40_v56 = vpack.c.bf16 %v33_v54, %v33_v54  ;;  %v1109_v61 = vld [vmem:[%s1463_s1 + $0x138] sm:$0xff]   ;;  %v32_v62 = vld [vmem:[%s1462_s0 + $0x20] sm:$0xff] }
  0x14   :  { %937 = vmatprep.subr.bf16.mxu0 %v1082_v20 }
  0x15   :  { %958 = vmatpush3.bf16.msra.mxu1 %v1081_v19 }
  0x16   :  { %959 = vmatprep.subr.bf16.mxu1 %v1084_v22 }
  0x17   :  { %938 = vmatpush3.bf16.msra.mxu0 %v1083_v21 }
  0x18   :  { %939 = vmatprep.subr.bf16.mxu0 %v1086_v24 }
  0x19   :  { %960 = vmatpush3.bf16.msra.mxu1 %v1085_v23 }
  0x1a   :  { %961 = vmatprep.subr.bf16.mxu1 %v1088_v26 }
  0x1b   :  { %940 = vmatpush3.bf16.msra.mxu0 %v1087_v25 }
  0x1c   :  { %941 = vmatprep.subr.bf16.mxu0 %v1090_v28 }
  0x1d   :  { %962 = vmatpush3.bf16.msra.mxu1 %v1089_v27 }
  0x1e   :  { %963 = vmatprep.subr.bf16.mxu1 %v1092_v30 }
  0x1f   :  { %942 = vmatpush3.bf16.msra.mxu0 %v1091_v29 }
  0x20   :  { %971 = vmatprep.subr.bf16.mxu0 %v1094_v36 }
  0x21   :  { %964 = vmatpush3.bf16.msra.mxu1 %v1093_v33 }
  0x22   :  { %478 = vmatmul.mubr.bf16.vlgmr.msra.gmra.mrb[0].mxu0 %v35_v35  ;;  %1013 = vmatprep.subr.bf16.mxu1 %v1159_v44 }
  0x23   :  { %972 = vmatpush3.bf16.msra.mxu0 %v1095_v39  ;;  %557 = vmatprep.mubr.bf16.mxu0 %v40_v56 }
  0x24   :  { %518 = vmatmul.mubr.bf16.vlgmr.msra.gmra.mrb[0].mxu1 %v37_v41  ;;  %973 = vmatprep.subr.bf16.mxu0 %v1096_v42 }
  0x25   :  { %1015 = vmatprep.mubr.msk.bf16.mxu1 %vm1160_vm0, %v1159_v44  ;;  %1014 = vmatpush3.bf16.msra.mxu1 %v1110_v53 }
  0x26   :  { %1019 = vmatprep.subr.bf16.mxu1 %v1159_v44 }
  0x27   :  { %974 = vmatpush3.bf16.msra.mxu0 %v1097_v43 }
  0x28   :  { %975 = vmatprep.subr.bf16.mxu0 %v1098_v45 }
  0x2b   :  { %976 = vmatpush3.bf16.msra.mxu0 %v1099_v46 }
  0x2c   :  { %977 = vmatprep.subr.bf16.mxu0 %v1100_v47  ;;  %1016 = vmatmul.mubr.msk.bf16.vlgmr.msra.gmra.mrb[4].mxu1 %vm441_vm1, %v41_v58 }
  0x2d   :  { %1035 = vmatprep.mubr.msk.bf16.mxu1 %vm1160_vm0, %v1159_v44 }
  0x2f   :  { %978 = vmatpush3.bf16.msra.mxu0 %v1101_v48 }
  0x30   :  { %979 = vmatprep.subr.bf16.mxu0 %v1102_v49 }
  0x33   :  { %980 = vmatpush3.bf16.msra.mxu0 %v1103_v50 }
  0x34   :  { %981 = vmatprep.subr.bf16.mxu0 %v1104_v51 }
  0x37   :  { %982 = vmatpush3.bf16.msra.mxu0 %v1105_v52 }
  0x38   :  { %983 = vmatprep.subr.bf16.mxu0 %v1106_v55 }
  0x3b   :  { %984 = vmatpush3.bf16.msra.mxu0 %v1107_v59 }
  0x3c   :  { %985 = vmatprep.subr.bf16.mxu0 %v1108_v60 }
  0x3d   :  { %12 = vsyncpa [#allocation3], 0  ;;  %v39_v63 = vpack.c.bf16 %v32_v62, %v32_v62  ;;  %v1111_v0 = vld [vmem:[%s1465_s3] sm:$0xff]   ;;  %v1112_v1 = vld [vmem:[%s1465_s3 + $0x8] sm:$0xff]   ;;  %s1161_s29 = smov [#allocation2]  }
  0x3e   :  { %1020 = vmatpush3.bf16.msra.mxu1 %v1111_v0  ;;  %v1113_v2 = vld [vmem:[%s1465_s3 + $0x10] sm:$0xff]   ;;  %v1114_v3 = vld [vmem:[%s1465_s3 + $0x18] sm:$0xff]   ;;  %v1115_v4 = vld [vmem:[%s1465_s3 + $0x20] sm:$0xff]   ;;  %s848_s30 = sshll.u32 %s1161_s29, 4  ;;  %s849_s30 = int_to_ptr.vmem [resolvable:$true] %s848_s30 }
  0x3f   :  { %986 = vmatpush3.bf16.msra.mxu0 %v1109_v61  ;;  %1021 = vmatprep.subr.bf16.mxu1 %v1159_v44  ;;  %v1116_v5 = vld [vmem:[%s1465_s3 + $0x28] sm:$0xff]   ;;  %v1117_v6 = vld [vmem:[%s1465_s3 + $0x30] sm:$0xff]   ;;  %v1118_v7 = vld [vmem:[%s1465_s3 + $0x38] sm:$0xff]   ;;  %p1140_p1 = scmp.lt.s32.totalorder %s849_s30, %s849_s30 }
  0x40   :  { %1039 = vmatprep.subr.bf16.mxu0 %v1159_v44  ;;  %v856_v9 = vld [vmem:[%s1464_s2] ss:$0 sm:$0xff]  ;;  %v1120_v38 = vld [vmem:[%s1467_s5 + $0x8] sm:$0xff]   ;;  %v1121_v39 = vld [vmem:[%s1467_s5 + $0x10] sm:$0xff]  }
  0x41   :  { %v1119_v37 = vld [vmem:[%s1467_s5] sm:$0xff]   ;;  %v1122_v40 = vld [vmem:[%s1467_s5 + $0x18] sm:$0xff]   ;;  %v1124_v42 = vld [vmem:[%s1467_s5 + $0x28] sm:$0xff]  }
  0x42   :  { %558 = vmatmul.mubr.bf16.vlgmr.msra.gmra.mrb[4].mxu0 %v39_v63  ;;  %1022 = vmatpush3.bf16.msra.mxu1 %v1112_v1  ;;  %v1123_v41 = vld [vmem:[%s1467_s5 + $0x20] sm:$0xff]   ;;  %v1125_v43 = vld [vmem:[%s1467_s5 + $0x30] sm:$0xff]   ;;  %v1126_v45 = vld [vmem:[%s1467_s5 + $0x38] sm:$0xff]  }
  0x43   :  { %1055 = vmatprep.mubr.msk.bf16.mxu0 %vm1160_vm0, %v1159_v44  ;;  %1023 = vmatprep.subr.bf16.mxu1 %v1159_v44  ;;  %v908_v46 = vld [vmem:[%s1466_s4] ss:$0 sm:$0xff]  ;;  %s1135_s4 = scalar_lea.vmem %s849_s30, 128 }
  0x44   :  { %1040 = vmatpush3.bf16.msra.mxu0 %v1119_v37  ;;  %p1136_p0 = scmp.ne.s32.totalorder %s849_s30, %s1135_s4  ;;  %p1141_p2 = scmp.lt.s32.totalorder %s1135_s4, %s1135_s4 }
  0x45   :  { %1041 = vmatprep.subr.bf16.mxu0 %v1159_v44 }
  0x46   :  { %1024 = vmatpush3.bf16.msra.mxu1 %v1113_v2  ;;  %p1142_p3 = por %p1141_p2, %p1140_p1 }
  0x47   :  { %1025 = vmatprep.subr.bf16.mxu1 %v1159_v44 }
  0x48   :  { %1042 = vmatpush3.bf16.msra.mxu0 %v1120_v38  ;;  %p1143_p4 = pnand %p1142_p3, %p1136_p0 }
  0x49   :  { %1043 = vmatprep.subr.bf16.mxu0 %v1159_v44 }
  0x4a   :  { %1026 = vmatpush3.bf16.msra.mxu1 %v1114_v3 }
  0x4b   :  { %1027 = vmatprep.subr.bf16.mxu1 %v1159_v44 }
  0x4c   :  { %1044 = vmatpush3.bf16.msra.mxu0 %v1121_v39 }
  0x4d   :  { %1045 = vmatprep.subr.bf16.mxu0 %v1159_v44 }
  0x4e   :  { %1028 = vmatpush3.bf16.msra.mxu1 %v1115_v4 }
  0x4f   :  { %1029 = vmatprep.subr.bf16.mxu1 %v1159_v44 }
  0x50   :  { %1046 = vmatpush3.bf16.msra.mxu0 %v1122_v40 }
  0x51   :  { %1047 = vmatprep.subr.bf16.mxu0 %v1159_v44 }
  0x52   :  { %1030 = vmatpush3.bf16.msra.mxu1 %v1116_v5 }
  0x53   :  { %1031 = vmatprep.subr.bf16.mxu1 %v1159_v44 }
  0x54   :  { %1048 = vmatpush3.bf16.msra.mxu0 %v1123_v41 }
  0x55   :  { %1049 = vmatprep.subr.bf16.mxu0 %v1159_v44 }
  0x56   :  { %1032 = vmatpush3.bf16.msra.mxu1 %v1117_v6 }
  0x57   :  { %1033 = vmatprep.subr.bf16.mxu1 %v1159_v44 }
  0x58   :  { %1050 = vmatpush3.bf16.msra.mxu0 %v1124_v42 }
  0x59   :  { %1051 = vmatprep.subr.bf16.mxu0 %v1159_v44 }
  0x5a   :  { %1034 = vmatpush3.bf16.msra.mxu1 %v1118_v7 }
  0x5c   :  { %1052 = vmatpush3.bf16.msra.mxu0 %v1125_v43 }
  0x5d   :  { %1053 = vmatprep.subr.bf16.mxu0 %v1159_v44  ;;  %v918_v44 = vld [vmem:[%s1468_s6] ss:$0 sm:$0xff] }
  0x60   :  { %1054 = vmatpush3.bf16.msra.mxu0 %v1126_v45 }
  0xf5   :  { %v943_v8 = vpop.f32.mrb[0].mxu0 }
  0xf6   :  { %v944_v10 = vpop.f32.mrb[1].mxu0 }
  0xf7   :  { %v945_v11 = vadd.f32 %v944_v10, %v943_v8  ;;  %v946_v12 = vpop.f32.mrb[2].mxu0  ;;  %v965_v13 = vpop.f32.mrb[0].mxu1 }
  0xf8   :  { %v947_v14 = vpop.f32.mrb[3].mxu0  ;;  %v966_v16 = vpop.f32.mrb[1].mxu1 }
  0xf9   :  { %v480_v15 = vadd.f32 %v945_v11, %v856_v9  ;;  %v967_v17 = vadd.f32 %v966_v16, %v965_v13  ;;  %v968_v18 = vpop.f32.mrb[2].mxu1 }
  0xfa   :  { %v969_v19 = vpop.f32.mrb[3].mxu1 }
  0xfb   :  { %v520_v20 = vadd.f32 %v967_v17, %v480_v15 }
  0xff   :  { %v599_v21 = vpop.f32.mrb[4].mxu1 }
 0x100   :  { %v1017_v22 = vpop.f32.mrb[5].mxu1 }
 0x101   :  { %v602_v23 = vpop.f32.mrb[6].mxu1 }
 0x102   :  { %v1018_v24 = vpop.f32.mrb[7].mxu1 }
 0x115   :  { %v987_v25 = vpop.f32.mrb[4].mxu0 }
 0x116   :  { %v988_v26 = vpop.f32.mrb[5].mxu0 }
 0x117   :  { %v989_v27 = vadd.f32 %v988_v26, %v987_v25  ;;  %v990_v28 = vpop.f32.mrb[6].mxu0 }
 0x118   :  { %v991_v29 = vpop.f32.mrb[7].mxu0 }
 0x119   :  { %v560_v30 = vadd.f32 %v989_v27, %v520_v20 }
 0x11b   :  { %v600_v31 = vadd.f32 %v599_v21, %v560_v30 }
 0x11d   :  { %v907_v32 = vmul.f32 -1.442695, %v600_v31 }
 0x11f   :  { %1127 = vpow2.f32 %v907_v32 }
 0x129   :  { %v1128_v33 = vpop.eup %1127 }
 0x12a   :  { %v608_v34 = vadd.f32 1.0, %v1128_v33 }
 0x12c   :  { %1129 = vrcp.f32 %v608_v34 }
 0x136   :  { %v1130_v35 = vpop.eup %1129 }
 0x137   :  { %v611_v36 = vpack.c.bf16 %v1130_v35, %v1130_v35 }
 0x139   :  { %1036 = vmatmul.mubr.bf16.vlgmr.msra.gmra.mrb[8].mxu1 %v611_v36 }
 0x20c   :  { %v717_v47 = vpop.f32.mrb[8].mxu1 }
 0x20d   :  { %v718_v48 = vadd.f32 %v908_v46, %v717_v47  ;;  %v1037_v49 = vpop.f32.mrb[9].mxu1 }
 0x20e   :  { %v720_v50 = vpop.f32.mrb[10].mxu1 }
 0x20f   :  { %v917_v51 = vmul.f32 -1.442695, %v718_v48  ;;  %v1038_v52 = vpop.f32.mrb[11].mxu1 }
 0x211   :  { %1131 = vpow2.f32 %v917_v51 }
 0x21b   :  { %v1132_v53 = vpop.eup %1131 }
 0x21c   :  { %v726_v54 = vadd.f32 1.0, %v1132_v53 }
 0x21e   :  { %1133 = vrcp.f32 %v726_v54 }
 0x228   :  { %v1134_v55 = vpop.eup %1133 }
 0x229   :  { %v729_v56 = vpack.c.bf16 %v1134_v55, %v1134_v55 }
 0x22b   :  { %1056 = vmatmul.mubr.bf16.vlgmr.msra.gmra.mrb[8].mxu0 %v729_v56 }
 0x2fe   :  { %v835_v57 = vpop.f32.mrb[8].mxu0 }
 0x2ff   :  { %v836_v58 = vadd.f32 %v918_v44, %v835_v57  ;;  %v1057_v59 = vpop.f32.mrb[9].mxu0 }
 0x300   :  { %v838_v60 = vpop.f32.mrb[10].mxu0 }
 0x301   :  { %841 = vst [vmem:[#allocation2] sm:$0xff] %v836_v58  ;;  %v1058_v61 = vpop.f32.mrb[11].mxu0 }
 0x302   :  { %1146 = shalt.err (!%p1143_p4)
}
 0x303   :  { %s1147_s6 = scalar_lea.hbm %s1469_s7, 128 }
 0x304   :  { %p1148_p5 = scmp.ne.s32.totalorder %s1469_s7, %s1147_s6  ;;  %p1151_p6 = scmp.lt.u32.totalorder %s1147_s6, %s1469_s7 }
 0x306   :  { %p1153_p7 = pnand %p1151_p6, %p1148_p5 }
 0x308   :  { %1156 = shalt.err (!%p1153_p7)
}
 0x309   :  { %851 = dma.vmem_to_hbm [thread:$0]  %s849_s30, 128, %s1469_s7, [#allocation3]  }
 0x30a   :  { %1157 = dma.done.wait [#allocation3], 128  }
 0x30b   :  { %1158 = vsyncadd [#allocation3], 4294967168 }
 0x30c   :  { %855 = vsyncpa [#allocation3], 1 }

</bundles_post_ra>
